<compile_context>
chip_gen: v5e
topology: v5e:2x2
jax: 0.10.0
libtpu: 0.0.40
codegen_flags: <defaults>
</compile_context>

<pallas_src>
import functools

import jax
import jax.numpy as jnp
from jax.experimental import pallas as pl
from jax.experimental.pallas import tpu as pltpu

LANE = 128


def _round_up(v, m):
    return ((v + m - 1) // m) * m


def _pad2d(x, rows, cols):
    return jnp.pad(x, ((0, rows - x.shape[0]), (0, cols - x.shape[1])))


def net_appnp_kernel(a_ref, x_ref, w1_ref, b1_ref, w2_ref, b2_ref,
                     w3_ref, b3_ref, o_ref, *, k_iters, alpha):
    # ---- MLP head: all activations stay in VMEM/vregs (no HBM bounce). ----
    h = jnp.dot(x_ref[...], w1_ref[...], preferred_element_type=jnp.float32)
    h = jnp.maximum(h + b1_ref[...], 0.0)
    # dropout: identity (eval mode)
    h = jnp.dot(h, w2_ref[...], preferred_element_type=jnp.float32)
    h = jnp.maximum(h + b2_ref[...], 0.0)
    h = jnp.dot(h, w3_ref[...], preferred_element_type=jnp.float32) + b3_ref[...]

    # ---- APPNP propagation: h <- (1-alpha) * A_sym @ h + alpha * x0 ----
    x0 = h
    a = a_ref[...].astype(jnp.float32)  # bf16 in HBM, f32 accumulation on MXU
    for _ in range(k_iters):            # K is small & static -> unrolled
        h = (1.0 - alpha) * jnp.dot(a, h, preferred_element_type=jnp.float32) \
            + alpha * x0
    o_ref[...] = h.astype(o_ref.dtype)


def net_appnp_forward(params, x, adj, *, k_iters, alpha):
    """Fused forward. x: [N, in_dim], adj: [N, N] (GCN-normalized, f32)."""
    (w1, b1), (w2, b2), (w3, b3) = params
    n, in_dim = x.shape
    hid_dim = w1.shape[1]
    out_dim = w3.shape[1]

    # Lane-dense padding of every feature dimension (zero pads are exact:
    # padded weight rows/cols and biases are zero, so results are unchanged).
    dp = _round_up(in_dim, LANE)
    hp = _round_up(hid_dim, LANE)
    op = _round_up(out_dim, LANE)

    xp = _pad2d(x, n, dp)
    w1p = _pad2d(w1, dp, hp)
    b1p = _pad2d(b1, 1, hp)
    w2p = _pad2d(w2, hp, hp)
    b2p = _pad2d(b2, 1, hp)
    w3p = _pad2d(w3, hp, op)
    b3p = _pad2d(b3, 1, op)
    a_bf16 = adj.astype(jnp.bfloat16)   # halves N^2 HBM traffic

    in_arrays = (a_bf16, xp, w1p, b1p, w2p, b2p, w3p, b3p)
    bytes_accessed = sum(int(v.size) * v.dtype.itemsize for v in in_arrays) \
        + n * op * 4
    flops = 2 * n * (dp * hp + hp * hp + hp * op) + k_iters * (2 * n * n * op + 3 * n * op)
    # Everything is single-tiled; double-buffer worst case + headroom.
    vmem_limit = int(2 * bytes_accessed + (4 << 20))

    kern = functools.partial(net_appnp_kernel, k_iters=k_iters, alpha=alpha)

    out = pl.pallas_call(
        kern,
        out_shape=jax.ShapeDtypeStruct((n, op), jnp.float32),
        grid_spec=pltpu.PrefetchScalarGridSpec(
            num_scalar_prefetch=0,
            grid=(1,),  # whole (small) graph is one VMEM-resident tile
            in_specs=[
                pl.BlockSpec((n, n), lambda i: (0, 0)),     # A_sym (bf16)
                pl.BlockSpec((n, dp), lambda i: (0, 0)),    # X (padded)
                pl.BlockSpec((dp, hp), lambda i: (0, 0)),   # W1
                pl.BlockSpec((1, hp), lambda i: (0, 0)),    # b1
                pl.BlockSpec((hp, hp), lambda i: (0, 0)),   # W2
                pl.BlockSpec((1, hp), lambda i: (0, 0)),    # b2
                pl.BlockSpec((hp, op), lambda i: (0, 0)),   # W3
                pl.BlockSpec((1, op), lambda i: (0, 0)),    # b3
            ],
            out_specs=pl.BlockSpec((n, op), lambda i: (0, 0)),
        ),
        compiler_params=pltpu.CompilerParams(
            dimension_semantics=("arbitrary",),
            vmem_limit_bytes=vmem_limit),
        cost_estimate=pl.CostEstimate(flops=int(flops), transcendentals=0,
                                      bytes_accessed=int(bytes_accessed)),
    )(*in_arrays)

    return out[:, :out_dim]


def net_appnp_ref(params, x, adj, *, k_iters, alpha):
    """Pure-JAX reference (same math, unpadded)."""
    (w1, b1), (w2, b2), (w3, b3) = params
    h = jnp.maximum(x @ w1 + b1, 0.0)
    h = jnp.maximum(h @ w2 + b2, 0.0)
    h = h @ w3 + b3
    x0 = h
    for _ in range(k_iters):
        h = (1.0 - alpha) * (adj @ h) + alpha * x0
    return h


def build_gcn_adjacency(edge_index, num_nodes):
    """Dense GCN-normalized adjacency: D^-1/2 (A + A^T + I) D^-1/2."""
    src, tgt = edge_index[0], edge_index[1]
    a = jnp.zeros((num_nodes, num_nodes), jnp.float32).at[tgt, src].set(1.0)
    a = jnp.maximum(a, a.T)                              # undirected
    a = a + jnp.eye(num_nodes, dtype=jnp.float32)        # self-loops
    deg = a.sum(axis=1)
    d_inv_sqrt = jnp.where(deg > 0.0, 1.0 / jnp.sqrt(deg), 0.0)
    return a * d_inv_sqrt[:, None] * d_inv_sqrt[None, :]


def init_params(key, in_dim, hid_dim, out_dim):
    """PyTorch-Linear-style init; weights stored pre-transposed [d_in, d_out]."""
    dims = [(in_dim, hid_dim), (hid_dim, hid_dim), (hid_dim, out_dim)]
    params = []
    for d_i, d_o in dims:
        key, kw, kb = jax.random.split(key, 3)
        scale = 1.0 / jnp.sqrt(jnp.float32(d_i))
        w = jax.random.uniform(kw, (d_i, d_o), jnp.float32, -scale, scale)
        b = jax.random.uniform(kb, (1, d_o), jnp.float32, -scale, scale)
        params.append((w, b))
    return params


if __name__ == "__main__":
    key = jax.random.PRNGKey(0)

    # Small, deterministic setup consistent with the module.
    num_nodes, in_dim, hid_dim, out_dim = 64, 16, 32, 8
    num_layers, alpha, num_edges = 3, 0.2, 128   # APPNP(K=num_layers, alpha=0.2)

    key, kx, ks, kt, kp = jax.random.split(key, 5)
    x = jax.random.normal(kx, (num_nodes, in_dim), jnp.float32)
    edge_index = jnp.stack([
        jax.random.randint(ks, (num_edges,), 0, num_nodes),
        jax.random.randint(kt, (num_edges,), 0, num_nodes),
    ], axis=0)

    params = init_params(kp, in_dim, hid_dim, out_dim)
    adj = build_gcn_adjacency(edge_index, num_nodes)

    out = jax.block_until_ready(
        net_appnp_forward(params, x, adj, k_iters=num_layers, alpha=alpha))

    # Reference uses the same bf16-quantized adjacency the kernel sees.
    adj_q = adj.astype(jnp.bfloat16).astype(jnp.float32)
    ref = jax.block_until_ready(
        net_appnp_ref(params, x, adj_q, k_iters=num_layers, alpha=alpha))

    assert out.shape == (num_nodes, out_dim), out.shape
    assert jnp.allclose(out, ref, atol=1e-3, rtol=1e-3), "mismatch vs JAX reference"
    print("KERNEL_OK")
</pallas_src>

<mosaic_0001>
module attributes {stable_mosaic.version = 11 : i64} {
  func.func @net_appnp_kernel(%arg0: i32, %arg1: memref<64x64xbf16, #tpu.memory_space<vmem>>, %arg2: memref<64x128xf32, #tpu.memory_space<vmem>>, %arg3: memref<128x128xf32, #tpu.memory_space<vmem>>, %arg4: memref<1x128xf32, #tpu.memory_space<vmem>>, %arg5: memref<128x128xf32, #tpu.memory_space<vmem>>, %arg6: memref<1x128xf32, #tpu.memory_space<vmem>>, %arg7: memref<128x128xf32, #tpu.memory_space<vmem>>, %arg8: memref<1x128xf32, #tpu.memory_space<vmem>>, %arg9: memref<64x128xf32, #tpu.memory_space<vmem>>) attributes {dimension_semantics = [#tpu.dimension_semantics<arbitrary>], iteration_bounds = array<i64: 1>, scalar_prefetch = 0 : i64, scratch_operands = 0 : i64, tpu.core_type = #tpu.core_type<tc>, window_params = [{pipeline_mode = #tpu.pipeline_mode<synchronous>, transform_indices = @transform_0, window_bounds = array<i64: 64, 64>}, {pipeline_mode = #tpu.pipeline_mode<synchronous>, transform_indices = @transform_1, window_bounds = array<i64: 64, 128>}, {pipeline_mode = #tpu.pipeline_mode<synchronous>, transform_indices = @transform_2, window_bounds = array<i64: 128, 128>}, {pipeline_mode = #tpu.pipeline_mode<synchronous>, transform_indices = @transform_3, window_bounds = array<i64: 1, 128>}, {pipeline_mode = #tpu.pipeline_mode<synchronous>, transform_indices = @transform_4, window_bounds = array<i64: 128, 128>}, {pipeline_mode = #tpu.pipeline_mode<synchronous>, transform_indices = @transform_5, window_bounds = array<i64: 1, 128>}, {pipeline_mode = #tpu.pipeline_mode<synchronous>, transform_indices = @transform_6, window_bounds = array<i64: 128, 128>}, {pipeline_mode = #tpu.pipeline_mode<synchronous>, transform_indices = @transform_7, window_bounds = array<i64: 1, 128>}, {pipeline_mode = #tpu.pipeline_mode<synchronous>, transform_indices = @transform_8, window_bounds = array<i64: 64, 128>}]} {
    %c0 = arith.constant 0 : index
    %c0_0 = arith.constant 0 : index
    %0 = vector.load %arg2[%c0, %c0_0] : memref<64x128xf32, #tpu.memory_space<vmem>>, vector<64x128xf32>
    %c0_1 = arith.constant 0 : index
    %c0_2 = arith.constant 0 : index
    %1 = vector.load %arg3[%c0_1, %c0_2] : memref<128x128xf32, #tpu.memory_space<vmem>>, vector<128x128xf32>
    %cst = arith.constant dense<0.000000e+00> : vector<64x128xf32>
    %2 = tpu.matmul %0, %1, %cst {dimension_numbers = #tpu.dot_dimension_numbers<[1], [0], [0], [1], [0, 0, 1, 1], [], []>} : vector<64x128xf32>, vector<128x128xf32>, vector<64x128xf32> -> vector<64x128xf32>
    %c0_3 = arith.constant 0 : index
    %c0_4 = arith.constant 0 : index
    %3 = vector.load %arg4[%c0_3, %c0_4] : memref<1x128xf32, #tpu.memory_space<vmem>>, vector<1x128xf32>
    %4 = vector.broadcast %3 : vector<1x128xf32> to vector<64x128xf32>
    %5 = arith.addf %2, %4 : vector<64x128xf32>
    %cst_5 = arith.constant 0.000000e+00 : f32
    %6 = vector.broadcast %cst_5 : f32 to vector<64x128xf32>
    %7 = arith.maximumf %5, %6 : vector<64x128xf32>
    %c0_6 = arith.constant 0 : index
    %c0_7 = arith.constant 0 : index
    %8 = vector.load %arg5[%c0_6, %c0_7] : memref<128x128xf32, #tpu.memory_space<vmem>>, vector<128x128xf32>
    %cst_8 = arith.constant dense<0.000000e+00> : vector<64x128xf32>
    %9 = tpu.matmul %7, %8, %cst_8 {dimension_numbers = #tpu.dot_dimension_numbers<[1], [0], [0], [1], [0, 0, 1, 1], [], []>} : vector<64x128xf32>, vector<128x128xf32>, vector<64x128xf32> -> vector<64x128xf32>
    %c0_9 = arith.constant 0 : index
    %c0_10 = arith.constant 0 : index
    %10 = vector.load %arg6[%c0_9, %c0_10] : memref<1x128xf32, #tpu.memory_space<vmem>>, vector<1x128xf32>
    %11 = vector.broadcast %10 : vector<1x128xf32> to vector<64x128xf32>
    %12 = arith.addf %9, %11 : vector<64x128xf32>
    %cst_11 = arith.constant 0.000000e+00 : f32
    %13 = vector.broadcast %cst_11 : f32 to vector<64x128xf32>
    %14 = arith.maximumf %12, %13 : vector<64x128xf32>
    %c0_12 = arith.constant 0 : index
    %c0_13 = arith.constant 0 : index
    %15 = vector.load %arg7[%c0_12, %c0_13] : memref<128x128xf32, #tpu.memory_space<vmem>>, vector<128x128xf32>
    %cst_14 = arith.constant dense<0.000000e+00> : vector<64x128xf32>
    %16 = tpu.matmul %14, %15, %cst_14 {dimension_numbers = #tpu.dot_dimension_numbers<[1], [0], [0], [1], [0, 0, 1, 1], [], []>} : vector<64x128xf32>, vector<128x128xf32>, vector<64x128xf32> -> vector<64x128xf32>
    %c0_15 = arith.constant 0 : index
    %c0_16 = arith.constant 0 : index
    %17 = vector.load %arg8[%c0_15, %c0_16] : memref<1x128xf32, #tpu.memory_space<vmem>>, vector<1x128xf32>
    %18 = vector.broadcast %17 : vector<1x128xf32> to vector<64x128xf32>
    %19 = arith.addf %16, %18 : vector<64x128xf32>
    %c0_17 = arith.constant 0 : index
    %c0_18 = arith.constant 0 : index
    %20 = vector.load %arg1[%c0_17, %c0_18] : memref<64x64xbf16, #tpu.memory_space<vmem>>, vector<64x64xbf16>
    %21 = arith.extf %20 : vector<64x64xbf16> to vector<64x64xf32>
    %cst_19 = arith.constant dense<0.000000e+00> : vector<64x128xf32>
    %22 = tpu.matmul %21, %19, %cst_19 {dimension_numbers = #tpu.dot_dimension_numbers<[1], [0], [0], [1], [0, 0, 1, 1], [], []>} : vector<64x64xf32>, vector<64x128xf32>, vector<64x128xf32> -> vector<64x128xf32>
    %cst_20 = arith.constant 8.000000e-01 : f32
    %23 = vector.broadcast %cst_20 : f32 to vector<64x128xf32>
    %24 = arith.mulf %23, %22 : vector<64x128xf32>
    %cst_21 = arith.constant 2.000000e-01 : f32
    %25 = vector.broadcast %cst_21 : f32 to vector<64x128xf32>
    %26 = arith.mulf %25, %19 : vector<64x128xf32>
    %27 = arith.addf %24, %26 : vector<64x128xf32>
    %cst_22 = arith.constant dense<0.000000e+00> : vector<64x128xf32>
    %28 = tpu.matmul %21, %27, %cst_22 {dimension_numbers = #tpu.dot_dimension_numbers<[1], [0], [0], [1], [0, 0, 1, 1], [], []>} : vector<64x64xf32>, vector<64x128xf32>, vector<64x128xf32> -> vector<64x128xf32>
    %cst_23 = arith.constant 8.000000e-01 : f32
    %29 = vector.broadcast %cst_23 : f32 to vector<64x128xf32>
    %30 = arith.mulf %29, %28 : vector<64x128xf32>
    %cst_24 = arith.constant 2.000000e-01 : f32
    %31 = vector.broadcast %cst_24 : f32 to vector<64x128xf32>
    %32 = arith.mulf %31, %19 : vector<64x128xf32>
    %33 = arith.addf %30, %32 : vector<64x128xf32>
    %cst_25 = arith.constant dense<0.000000e+00> : vector<64x128xf32>
    %34 = tpu.matmul %21, %33, %cst_25 {dimension_numbers = #tpu.dot_dimension_numbers<[1], [0], [0], [1], [0, 0, 1, 1], [], []>} : vector<64x64xf32>, vector<64x128xf32>, vector<64x128xf32> -> vector<64x128xf32>
    %cst_26 = arith.constant 8.000000e-01 : f32
    %35 = vector.broadcast %cst_26 : f32 to vector<64x128xf32>
    %36 = arith.mulf %35, %34 : vector<64x128xf32>
    %cst_27 = arith.constant 2.000000e-01 : f32
    %37 = vector.broadcast %cst_27 : f32 to vector<64x128xf32>
    %38 = arith.mulf %37, %19 : vector<64x128xf32>
    %39 = arith.addf %36, %38 : vector<64x128xf32>
    %c0_28 = arith.constant 0 : index
    %c0_29 = arith.constant 0 : index
    %40 = vector.load %arg9[%c0_28, %c0_29] : memref<64x128xf32, #tpu.memory_space<vmem>>, vector<64x128xf32>
    tpu.vector_store %arg9[%c0_28, %c0_29], %39 {strides = array<i32>} : memref<64x128xf32, #tpu.memory_space<vmem>>, vector<64x128xf32>,
    return
  }
  func.func @transform_0(%arg0: i32) -> (i32, i32) {
    %c0_i32 = arith.constant 0 : i32
    %c0_i32_0 = arith.constant 0 : i32
    %c0_i32_1 = arith.constant 0 : i32
    return %c0_i32, %c0_i32_0 : i32, i32
  }
  func.func @transform_1(%arg0: i32) -> (i32, i32) {
    %c0_i32 = arith.constant 0 : i32
    %c0_i32_0 = arith.constant 0 : i32
    %c0_i32_1 = arith.constant 0 : i32
    return %c0_i32, %c0_i32_0 : i32, i32
  }
  func.func @transform_2(%arg0: i32) -> (i32, i32) {
    %c0_i32 = arith.constant 0 : i32
    %c0_i32_0 = arith.constant 0 : i32
    %c0_i32_1 = arith.constant 0 : i32
    return %c0_i32, %c0_i32_0 : i32, i32
  }
  func.func @transform_3(%arg0: i32) -> (i32, i32) {
    %c0_i32 = arith.constant 0 : i32
    %c0_i32_0 = arith.constant 0 : i32
    %c0_i32_1 = arith.constant 0 : i32
    return %c0_i32, %c0_i32_0 : i32, i32
  }
  func.func @transform_4(%arg0: i32) -> (i32, i32) {
    %c0_i32 = arith.constant 0 : i32
    %c0_i32_0 = arith.constant 0 : i32
    %c0_i32_1 = arith.constant 0 : i32
    return %c0_i32, %c0_i32_0 : i32, i32
  }
  func.func @transform_5(%arg0: i32) -> (i32, i32) {
    %c0_i32 = arith.constant 0 : i32
    %c0_i32_0 = arith.constant 0 : i32
    %c0_i32_1 = arith.constant 0 : i32
    return %c0_i32, %c0_i32_0 : i32, i32
  }
  func.func @transform_6(%arg0: i32) -> (i32, i32) {
    %c0_i32 = arith.constant 0 : i32
    %c0_i32_0 = arith.constant 0 : i32
    %c0_i32_1 = arith.constant 0 : i32
    return %c0_i32, %c0_i32_0 : i32, i32
  }
  func.func @transform_7(%arg0: i32) -> (i32, i32) {
    %c0_i32 = arith.constant 0 : i32
    %c0_i32_0 = arith.constant 0 : i32
    %c0_i32_1 = arith.constant 0 : i32
    return %c0_i32, %c0_i32_0 : i32, i32
  }
  func.func @transform_8(%arg0: i32) -> (i32, i32) {
    %c0_i32 = arith.constant 0 : i32
    %c0_i32_0 = arith.constant 0 : i32
    %c0_i32_1 = arith.constant 0 : i32
    return %c0_i32, %c0_i32_0 : i32, i32
  }
}

</mosaic_0001>

<bundles_post_ra>
// kernel: tpu_custom_call.1
= control target key start
LH: loop header
LB: loop body
LE: loop exit
PB: predicated region body
PF: predicated region fallthrough
CT: control target
= control target key end

     0   :  { %13 = vsyncpa [#allocation3], 0  ;;  %s992_s0 = inlined_call_operand.hbm [shape: bf16[64,64], index: 0, kind: input, shape index: {}]   ;;  %s993_s1 = inlined_call_operand.hbm [shape: f32[64,128], index: 1, kind: input, shape index: {}]   ;;  %s994_s2 = inlined_call_operand.hbm [shape: f32[128,128], index: 2, kind: input, shape index: {}]   ;;  %s995_s3 = inlined_call_operand.vmem [shape: f32[1,128], index: 3, kind: input, shape index: {}]   ;;  %s996_s4 = inlined_call_operand.hbm [shape: f32[128,128], index: 4, kind: input, shape index: {}]   ;;  %s997_s5 = inlined_call_operand.vmem [shape: f32[1,128], index: 5, kind: input, shape index: {}]   ;;  %s998_s6 = inlined_call_operand.hbm [shape: f32[128,128], index: 6, kind: input, shape index: {}]   ;;  %s999_s7 = inlined_call_operand.vmem [shape: f32[1,128], index: 7, kind: input, shape index: {}]   ;;  %s1000_s8 = inlined_call_operand.hbm [shape: f32[64,128], index: 8, kind: output, shape index: {}]  }
   0x1   :  { %14 = vsyncpa [#allocation6], 0 }
   0x2   :  { %15 = vsyncpa [#allocation9], 0  ;;  %s34_s29 = sshll.u32 %s993_s1, 4  ;;  %s35_s29 = int_to_ptr.hbm [resolvable:$true] %s34_s29 }
   0x3   :  { %16 = vsyncpa [#allocation4], 0  ;;  %s796_s30 = smov [#allocation5]   ;;  %s62_s12 = sshll.u32 %s996_s4, 4  ;;  %s63_s12 = int_to_ptr.hbm [resolvable:$true] %s62_s12 }
   0x4   :  { %s36_s9 = sshll.u32 %s796_s30, 4  ;;  %s797_s13 = smov 128   ;;  %s37_s9 = int_to_ptr.vmem [resolvable:$true] %s36_s9 }
   0x5   :  { %s798_s14 = smov 8   ;;  %s799_s15 = smov [#allocation8]  }
   0x6   :  { %42 = dma.hbm_to_vmem [thread:$0]  %s35_s29, 1024, %s37_s9, [#allocation6], %s797_s13, %s797_s13, %s798_s14  }
   0x7   :  { %s64_s16 = sshll.u32 %s799_s15, 4  ;;  %s21_s18 = sshll.u32 %s992_s0, 4  ;;  %s65_s16 = int_to_ptr.vmem [resolvable:$true] %s64_s16  ;;  %s22_s18 = int_to_ptr.hbm [resolvable:$true] %s21_s18 }
   0x8   :  { %70 = dma.hbm_to_vmem [thread:$0]  %s63_s12, 2048, %s65_s16, [#allocation9], %s797_s13, %s797_s13, %s798_s14  }
   0x9   :  { %s800_s4 = smov [#allocation2]   ;;  %s47_s22 = sshll.u32 %s994_s2, 4  ;;  %s48_s22 = int_to_ptr.hbm [resolvable:$true] %s47_s22 }
   0xa   :  { %s23_s19 = sshll.u32 %s800_s4, 4  ;;  %s801_s23 = smov 64   ;;  %s24_s19 = int_to_ptr.vmem [resolvable:$true] %s23_s19 }
   0xb   :  { %s802_s24 = smov 4   ;;  %s803_s25 = smov [#allocation7]  }
   0xc   :  { %29 = dma.hbm_to_vmem [thread:$0]  %s22_s18, 512, %s24_s19, [#allocation3], %s801_s23, %s801_s23, %s802_s24  }
   0xd   :  { %s49_s26 = sshll.u32 %s803_s25, 4  ;;  %s77_s28 = sshll.u32 %s998_s6, 4  ;;  %s50_s26 = int_to_ptr.vmem [resolvable:$true] %s49_s26  ;;  %s78_s28 = int_to_ptr.hbm [resolvable:$true] %s77_s28 }
   0xe   :  { %55 = dma.hbm_to_vmem [thread:$0]  %s48_s22, 2048, %s50_s26, [#allocation6], %s797_s13, %s797_s13, %s798_s14  }
   0xf   :  { %s804_s29 = smov [#allocation10]  }
  0x10   :  { %s79_s30 = sshll.u32 %s804_s29, 4  ;;  %s80_s30 = int_to_ptr.vmem [resolvable:$true] %s79_s30 }
  0x11   :  { %85 = dma.hbm_to_vmem [thread:$0]  %s78_s28, 2048, %s80_s30, [#allocation9], %s797_s13, %s797_s13, %s798_s14  }
  0x12   :  { %788 = dma.done.wait [#allocation3], 512  }
  0x13   :  { %789 = vsyncadd [#allocation3], 4294966784 }
  0x14   :  { %790 = dma.done.wait [#allocation6], 3072  }
  0x15   :  { %791 = vsyncadd [#allocation6], 4294964224 }
  0x16   :  { %792 = dma.done.wait [#allocation9], 4096  }
  0x17   :  { %793 = vsyncadd [#allocation9], 4294963200  ;;  %v131_v0 = vld [vmem:[#allocation7 + $0x78] sm:$0xff]  ;;  %v130_v1 = vld [vmem:[#allocation7 + $0x70] sm:$0xff]  ;;  %vm331_vm0 = vcmask 523264   ;;  %s549_s16 = sshll.u32 %s1000_s8, 4  ;;  %s550_s16 = int_to_ptr.hbm [resolvable:$true] %s549_s16 }
  0x18   :  { %136 = vmatpush.msra.mxu0 %v131_v0  ;;  %607 = vmatpush.msra.mxu1 %v131_v0  ;;  %v129_v2 = vld [vmem:[#allocation7 + $0x68] sm:$0xff]  ;;  %v128_v3 = vld [vmem:[#allocation7 + $0x60] sm:$0xff]  ;;  %v127_v4 = vld [vmem:[#allocation7 + $0x58] sm:$0xff] }
  0x19   :  { %v126_v5 = vld [vmem:[#allocation7 + $0x50] sm:$0xff]  ;;  %v125_v6 = vld [vmem:[#allocation7 + $0x48] sm:$0xff]  ;;  %v124_v7 = vld [vmem:[#allocation7 + $0x40] sm:$0xff] }
  0x1a   :  { %137 = vmatpush.msra.mxu0 %v130_v1  ;;  %608 = vmatpush.msra.mxu1 %v130_v1  ;;  %v123_v8 = vld [vmem:[#allocation7 + $0x38] sm:$0xff]  ;;  %v122_v9 = vld [vmem:[#allocation7 + $0x30] sm:$0xff]  ;;  %v121_v10 = vld [vmem:[#allocation7 + $0x28] sm:$0xff] }
  0x1b   :  { %v120_v11 = vld [vmem:[#allocation7 + $0x20] sm:$0xff]  ;;  %v119_v12 = vld [vmem:[#allocation7 + $0x18] sm:$0xff]  ;;  %v118_v13 = vld [vmem:[#allocation7 + $0x10] sm:$0xff] }
  0x1c   :  { %138 = vmatpush.msra.mxu0 %v129_v2  ;;  %609 = vmatpush.msra.mxu1 %v129_v2  ;;  %v117_v14 = vld [vmem:[#allocation7 + $0x8] sm:$0xff]  ;;  %v116_v15 = vld [vmem:[#allocation7] sm:$0xff]  ;;  %v200_v18 = vld [vmem:[#allocation8 + $0x78] sm:$0xff] }
  0x1d   :  { %v108_v16 = vld [vmem:[#allocation5] sm:$0xff]  ;;  %v199_v19 = vld [vmem:[#allocation8 + $0x70] sm:$0xff]  ;;  %v198_v20 = vld [vmem:[#allocation8 + $0x68] sm:$0xff] }
  0x1e   :  { %139 = vmatpush.msra.mxu0 %v128_v3  ;;  %610 = vmatpush.msra.mxu1 %v128_v3  ;;  %v112_v17 = vld [vmem:[#allocation5 + $0x20] sm:$0xff]  ;;  %v109_v22 = vld [vmem:[#allocation5 + $0x8] sm:$0xff]  ;;  %v196_v24 = vld [vmem:[#allocation8 + $0x58] sm:$0xff] }
  0x1f   :  { %v197_v21 = vld [vmem:[#allocation8 + $0x60] sm:$0xff]  ;;  %v113_v23 = vld [vmem:[#allocation5 + $0x28] sm:$0xff]  ;;  %v195_v25 = vld [vmem:[#allocation8 + $0x50] sm:$0xff] }
  0x20   :  { %140 = vmatpush.msra.mxu0 %v127_v4  ;;  %611 = vmatpush.msra.mxu1 %v127_v4  ;;  %v194_v26 = vld [vmem:[#allocation8 + $0x48] sm:$0xff]  ;;  %v193_v27 = vld [vmem:[#allocation8 + $0x40] sm:$0xff]  ;;  %v110_v28 = vld [vmem:[#allocation5 + $0x10] sm:$0xff] }
  0x21   :  { %v114_v29 = vld [vmem:[#allocation5 + $0x30] sm:$0xff]  ;;  %v192_v30 = vld [vmem:[#allocation8 + $0x38] sm:$0xff]  ;;  %v190_v32 = vld [vmem:[#allocation8 + $0x28] sm:$0xff] }
  0x22   :  { %141 = vmatpush.msra.mxu0 %v126_v5  ;;  %612 = vmatpush.msra.mxu1 %v126_v5  ;;  %v191_v31 = vld [vmem:[#allocation8 + $0x30] sm:$0xff]  ;;  %v189_v33 = vld [vmem:[#allocation8 + $0x20] sm:$0xff]  ;;  %v111_v34 = vld [vmem:[#allocation5 + $0x18] sm:$0xff] }
  0x23   :  { %v115_v35 = vld [vmem:[#allocation5 + $0x38] sm:$0xff]  ;;  %v187_v37 = vld [vmem:[#allocation8 + $0x10] sm:$0xff]  ;;  %v186_v38 = vld [vmem:[#allocation8 + $0x8] sm:$0xff] }
  0x24   :  { %142 = vmatpush.msra.mxu0 %v125_v6  ;;  %613 = vmatpush.msra.mxu1 %v125_v6  ;;  %v188_v36 = vld [vmem:[#allocation8 + $0x18] sm:$0xff]  ;;  %v185_v39 = vld [vmem:[#allocation8] sm:$0xff]  ;;  %v268_v56 = vld [vmem:[#allocation10 + $0x70] sm:$0xff] }
  0x25   :  { %v641_v40 = vld [vmem:[%s995_s3] ss:$0 sm:$0xff]  ;;  %v269_v55 = vld [vmem:[#allocation10 + $0x78] sm:$0xff]  ;;  %v267_v58 = vld [vmem:[#allocation10 + $0x68] sm:$0xff] }
  0x26   :  { %143 = vmatpush.msra.mxu0 %v124_v7  ;;  %614 = vmatpush.msra.mxu1 %v124_v7  ;;  %v266_v60 = vld [vmem:[#allocation10 + $0x60] sm:$0xff]  ;;  %v265_v61 = vld [vmem:[#allocation10 + $0x58] sm:$0xff]  ;;  %v264_v63 = vld [vmem:[#allocation10 + $0x50] sm:$0xff] }
  0x27   :  { %274 = vmatpush.msra.mxu2 %v269_v55  ;;  %v263_v0 = vld [vmem:[#allocation10 + $0x48] sm:$0xff]  ;;  %v262_v3 = vld [vmem:[#allocation10 + $0x40] sm:$0xff]  ;;  %v261_v4 = vld [vmem:[#allocation10 + $0x38] sm:$0xff] }
  0x28   :  { %144 = vmatpush.msra.mxu0 %v123_v8  ;;  %615 = vmatpush.msra.mxu1 %v123_v8  ;;  %v260_v6 = vld [vmem:[#allocation10 + $0x30] sm:$0xff]  ;;  %v259_v7 = vld [vmem:[#allocation10 + $0x28] sm:$0xff] }
  0x29   :  { %275 = vmatpush.msra.mxu2 %v268_v56 }
  0x2a   :  { %145 = vmatpush.msra.mxu0 %v122_v9  ;;  %616 = vmatpush.msra.mxu1 %v122_v9  ;;  %v258_v9 = vld [vmem:[#allocation10 + $0x20] sm:$0xff] }
  0x2b   :  { %276 = vmatpush.msra.mxu2 %v267_v58  ;;  %v604_v58 = vld [vmem:[#allocation2 + $0x8] sm:$0xff]  }
  0x2c   :  { %146 = vmatpush.msra.mxu0 %v121_v10  ;;  %617 = vmatpush.msra.mxu1 %v121_v10 }
  0x2d   :  { %277 = vmatpush.msra.mxu2 %v266_v60 }
  0x2e   :  { %147 = vmatpush.msra.mxu0 %v120_v11  ;;  %618 = vmatpush.msra.mxu1 %v120_v11  ;;  %v257_v11 = vld [vmem:[#allocation10 + $0x18] sm:$0xff] }
  0x2f   :  { %278 = vmatpush.msra.mxu2 %v265_v61  ;;  %v889_v61 = vunpack.c.l.bf16 %v604_v58 }
  0x30   :  { %148 = vmatpush.msra.mxu0 %v119_v12  ;;  %619 = vmatpush.msra.mxu1 %v119_v12 }
  0x31   :  { %279 = vmatpush.msra.mxu2 %v264_v63 }
  0x32   :  { %149 = vmatpush.msra.mxu0 %v118_v13  ;;  %620 = vmatpush.msra.mxu1 %v118_v13 }
  0x33   :  { %280 = vmatpush.msra.mxu2 %v263_v0  ;;  %v897_v0 = vunpack.c.h.bf16 %v604_v58 }
  0x34   :  { %150 = vmatpush.msra.mxu0 %v117_v14  ;;  %621 = vmatpush.msra.mxu1 %v117_v14  ;;  %v256_v14 = vld [vmem:[#allocation10 + $0x10] sm:$0xff] }
  0x35   :  { %281 = vmatpush.msra.mxu2 %v262_v3 }
  0x36   :  { %151 = vmatpush.msra.mxu0 %v116_v15  ;;  %622 = vmatpush.msra.mxu1 %v116_v15  ;;  %v255_v15 = vld [vmem:[#allocation10 + $0x8] sm:$0xff] }
  0x37   :  { %152 = vmatmul.f32.vlgmr.msra.gmra.mxu0 %v108_v16  ;;  %164 = vmatmul.f32.vlgmr.msra.gmra.mxu1 %v112_v17  ;;  %v254_v16 = vld [vmem:[#allocation10] sm:$0xff] }
  0x38   :  { %205 = vmatpush.msrb.mxu1 %v200_v18  ;;  %282 = vmatpush.msra.mxu2 %v261_v4  ;;  %v642_v17 = vld [vmem:[%s997_s5] ss:$0 sm:$0xff]  ;;  %v606_v4 = vld [vmem:[#allocation2 + $0x18] sm:$0xff]  }
  0x3a   :  { %206 = vmatpush.msrb.mxu1 %v199_v19  ;;  %283 = vmatpush.msra.mxu2 %v260_v6  ;;  %v915_v6 = vunpack.c.h.bf16 %v606_v4 }
  0x3c   :  { %207 = vmatpush.msrb.mxu1 %v198_v20  ;;  %284 = vmatpush.msra.mxu2 %v259_v7 }
  0x3e   :  { %208 = vmatpush.msrb.mxu1 %v197_v21  ;;  %285 = vmatpush.msra.mxu2 %v258_v9 }
  0x3f   :  { %155 = vmatmul.f32.gmra.mxu0 %v109_v22  ;;  %167 = vmatmul.f32.gmra.mxu1 %v113_v23 }
  0x40   :  { %209 = vmatpush.msrb.mxu1 %v196_v24  ;;  %286 = vmatpush.msra.mxu2 %v257_v11 }
  0x42   :  { %210 = vmatpush.msrb.mxu1 %v195_v25  ;;  %287 = vmatpush.msra.mxu2 %v256_v14 }
  0x44   :  { %211 = vmatpush.msrb.mxu1 %v194_v26  ;;  %288 = vmatpush.msra.mxu2 %v255_v15 }
  0x46   :  { %212 = vmatpush.msrb.mxu1 %v193_v27  ;;  %289 = vmatpush.msra.mxu2 %v254_v16 }
  0x47   :  { %158 = vmatmul.f32.gmra.mxu0 %v110_v28  ;;  %170 = vmatmul.f32.gmra.mxu1 %v114_v29 }
  0x48   :  { %213 = vmatpush.msrb.mxu1 %v192_v30 }
  0x4a   :  { %214 = vmatpush.msrb.mxu1 %v191_v31 }
  0x4c   :  { %215 = vmatpush.msrb.mxu1 %v190_v32 }
  0x4e   :  { %216 = vmatpush.msrb.mxu1 %v189_v33 }
  0x4f   :  { %161 = vmatmul.f32.gmra.mxu0 %v111_v34  ;;  %173 = vmatmul.f32.gmra.mxu1 %v115_v35 }
  0x50   :  { %217 = vmatpush.msrb.mxu1 %v188_v36 }
  0x52   :  { %218 = vmatpush.msrb.mxu1 %v187_v37 }
  0x54   :  { %219 = vmatpush.msrb.mxu1 %v186_v38 }
  0x56   :  { %220 = vmatpush.msrb.mxu1 %v185_v39 }
  0xb4   :  { %v153_v41 = vpop.f32.mrf.mxu0  ;;  %v165_v50 = vpop.f32.mrf.mxu1 }
  0xb5   :  { %v154_v42 = vadd.f32 %v641_v40, %v153_v41  ;;  %v166_v54 = vadd.f32 %v641_v40, %v165_v50 }
  0xb7   :  { %v177_v43 = vmax.f32 %v154_v42, 0.0  ;;  %v181_v59 = vmax.f32 %v166_v54, 0.0 }
  0xb9   :  { %221 = vmatmul.f32.vlgmr.msrb.gmra.mxu1 %v177_v43 }
  0xbc   :  { %v156_v44 = vpop.f32.mrf.mxu0  ;;  %v168_v57 = vpop.f32.mrf.mxu1 }
  0xbd   :  { %v157_v45 = vadd.f32 %v641_v40, %v156_v44  ;;  %v169_v62 = vadd.f32 %v641_v40, %v168_v57  ;;  %v589_v57 = vld [vmem:[#allocation2] sm:$0xff]  }
  0xbe   :  { %v887_v60 = vunpack.c.l.bf16 %v589_v57  ;;  %v895_v63 = vunpack.c.h.bf16 %v589_v57 }
  0xbf   :  { %v178_v46 = vmax.f32 %v157_v45, 0.0  ;;  %v182_v2 = vmax.f32 %v169_v62, 0.0 }
  0xc1   :  { %224 = vmatmul.f32.gmra.mxu1 %v178_v46 }
  0xc4   :  { %v159_v47 = vpop.f32.mrf.mxu0  ;;  %v171_v1 = vpop.f32.mrf.mxu1 }
  0xc5   :  { %v160_v48 = vadd.f32 %v641_v40, %v159_v47  ;;  %v172_v5 = vadd.f32 %v641_v40, %v171_v1  ;;  %v605_v1 = vld [vmem:[#allocation2 + $0x10] sm:$0xff]  }
  0xc6   :  { %v907_v3 = vunpack.c.h.bf16 %v605_v1 }
  0xc7   :  { %v179_v49 = vmax.f32 %v160_v48, 0.0  ;;  %v183_v8 = vmax.f32 %v172_v5, 0.0  ;;  %v911_v5 = vunpack.c.l.bf16 %v606_v4 }
  0xc9   :  { %227 = vmatmul.f32.gmra.mxu1 %v179_v49  ;;  %v643_v49 = vld [vmem:[%s999_s7] ss:$0 sm:$0xff]  ;;  %s805_s7 = smov [#allocation11]  }
  0xca   :  { %s547_s11 = sshll.u32 %s805_s7, 4  ;;  %s548_s11 = int_to_ptr.vmem [resolvable:$true] %s547_s11 }
  0xcc   :  { %v162_v51 = vpop.f32.mrf.mxu0  ;;  %v174_v10 = vpop.f32.mrf.mxu1 }
  0xcd   :  { %v163_v52 = vadd.f32 %v641_v40, %v162_v51  ;;  %v175_v12 = vadd.f32 %v641_v40, %v174_v10 }
  0xcf   :  { %v180_v53 = vmax.f32 %v163_v52, 0.0  ;;  %v184_v13 = vmax.f32 %v175_v12, 0.0 }
  0xd1   :  { %230 = vmatmul.f32.gmra.mxu1 %v180_v53 }
  0xd9   :  { %233 = vmatmul.f32.gmra.mxu1 %v181_v59 }
  0xe1   :  { %236 = vmatmul.f32.gmra.mxu1 %v182_v2  ;;  %v903_v2 = vunpack.c.l.bf16 %v605_v1 }
  0xe9   :  { %239 = vmatmul.f32.gmra.mxu1 %v183_v8 }
  0xf1   :  { %242 = vmatmul.f32.gmra.mxu1 %v184_v13 }
 0x136   :  { %v222_v18 = vpop.f32.mrf.mxu1 }
 0x137   :  { %v223_v19 = vadd.f32 %v642_v17, %v222_v18 }
 0x139   :  { %v246_v20 = vmax.f32 %v223_v19, 0.0 }
 0x13b   :  { %290 = vmatmul.f32.vlgmr.msra.gmra.mxu2 %v246_v20 }
 0x13e   :  { %v225_v21 = vpop.f32.mrf.mxu1 }
 0x13f   :  { %v226_v22 = vadd.f32 %v642_v17, %v225_v21 }
 0x141   :  { %v247_v23 = vmax.f32 %v226_v22, 0.0 }
 0x143   :  { %293 = vmatmul.f32.gmra.mxu2 %v247_v23 }
 0x146   :  { %v228_v24 = vpop.f32.mrf.mxu1 }
 0x147   :  { %v229_v25 = vadd.f32 %v642_v17, %v228_v24 }
 0x149   :  { %v248_v26 = vmax.f32 %v229_v25, 0.0 }
 0x14b   :  { %296 = vmatmul.f32.gmra.mxu2 %v248_v26 }
 0x14e   :  { %v231_v27 = vpop.f32.mrf.mxu1 }
 0x14f   :  { %v232_v28 = vadd.f32 %v642_v17, %v231_v27 }
 0x151   :  { %v249_v29 = vmax.f32 %v232_v28, 0.0 }
 0x153   :  { %299 = vmatmul.f32.gmra.mxu2 %v249_v29 }
 0x156   :  { %v234_v30 = vpop.f32.mrf.mxu1 }
 0x157   :  { %v235_v31 = vadd.f32 %v642_v17, %v234_v30 }
 0x159   :  { %v250_v32 = vmax.f32 %v235_v31, 0.0 }
 0x15b   :  { %302 = vmatmul.f32.gmra.mxu2 %v250_v32 }
 0x15e   :  { %v237_v33 = vpop.f32.mrf.mxu1 }
 0x15f   :  { %v238_v34 = vadd.f32 %v642_v17, %v237_v33 }
 0x161   :  { %v251_v35 = vmax.f32 %v238_v34, 0.0 }
 0x163   :  { %305 = vmatmul.f32.gmra.mxu2 %v251_v35 }
 0x166   :  { %v240_v36 = vpop.f32.mrf.mxu1 }
 0x167   :  { %v241_v37 = vadd.f32 %v642_v17, %v240_v36 }
 0x169   :  { %v252_v38 = vmax.f32 %v241_v37, 0.0 }
 0x16b   :  { %308 = vmatmul.f32.gmra.mxu2 %v252_v38 }
 0x16e   :  { %v243_v39 = vpop.f32.mrf.mxu1 }
 0x16f   :  { %v244_v40 = vadd.f32 %v642_v17, %v243_v39 }
 0x171   :  { %v253_v41 = vmax.f32 %v244_v40, 0.0 }
 0x173   :  { %311 = vmatmul.f32.gmra.mxu2 %v253_v41 }
 0x1be   :  { %v291_v42 = vpop.f32.mrf.mxu2 }
 0x1bf   :  { %v292_v62 = vadd.f32 %v643_v49, %v291_v42 }
 0x1c1   :  { %v405_v36 = vmul.f32 0.2, %v292_v62 }
 0x1c6   :  { %v294_v43 = vpop.f32.mrf.mxu2 }
 0x1c7   :  { %v295_v59 = vadd.f32 %v643_v49, %v294_v43 }
 0x1c9   :  { %v936_v33 = vmul.f32 0.2, %v295_v59 }
 0x1ce   :  { %v297_v44 = vpop.f32.mrf.mxu2 }
 0x1cf   :  { %v298_v56 = vadd.f32 %v643_v49, %v297_v44 }
 0x1d1   :  { %v933_v30 = vmul.f32 0.2, %v298_v56 }
 0x1d6   :  { %v300_v45 = vpop.f32.mrf.mxu2 }
 0x1d7   :  { %v301_v55 = vadd.f32 %v643_v49, %v300_v45 }
 0x1d9   :  { %v930_v27 = vmul.f32 0.2, %v301_v55 }
 0x1de   :  { %v303_v46 = vpop.f32.mrf.mxu2 }
 0x1df   :  { %v304_v54 = vadd.f32 %v643_v49, %v303_v46 }
 0x1e1   :  { %v927_v23 = vmul.f32 0.2, %v304_v54 }
 0x1e6   :  { %v306_v47 = vpop.f32.mrf.mxu2 }
 0x1e7   :  { %v307_v53 = vadd.f32 %v643_v49, %v306_v47 }
 0x1e9   :  { %v924_v20 = vmul.f32 0.2, %v307_v53 }
 0x1ee   :  { %v309_v48 = vpop.f32.mrf.mxu2 }
 0x1ef   :  { %v310_v52 = vadd.f32 %v643_v49, %v309_v48 }
 0x1f1   :  { %v921_v17 = vmul.f32 0.2, %v310_v52 }
 0x1f6   :  { %v312_v50 = vpop.f32.mrf.mxu2 }
 0x1f7   :  { %v313_v51 = vadd.f32 %v643_v49, %v312_v50 }
 0x1f9   :  { %364 = vmatpush.msrb.mxu2 %v313_v51  ;;  %623 = vmatpush.msra.mxu3 %v313_v51  ;;  %v919_v14 = vmul.f32 0.2, %v313_v51 }
 0x1fb   :  { %365 = vmatpush.msrb.mxu2 %v310_v52  ;;  %624 = vmatpush.msra.mxu3 %v310_v52 }
 0x1fd   :  { %366 = vmatpush.msrb.mxu2 %v307_v53  ;;  %625 = vmatpush.msra.mxu3 %v307_v53 }
 0x1ff   :  { %367 = vmatpush.msrb.mxu2 %v304_v54  ;;  %626 = vmatpush.msra.mxu3 %v304_v54 }
 0x201   :  { %368 = vmatpush.msrb.mxu2 %v301_v55  ;;  %627 = vmatpush.msra.mxu3 %v301_v55 }
 0x203   :  { %369 = vmatpush.msrb.mxu2 %v298_v56  ;;  %628 = vmatpush.msra.mxu3 %v298_v56 }
 0x205   :  { %370 = vmatpush.msrb.mxu2 %v295_v59  ;;  %629 = vmatpush.msra.mxu3 %v295_v59 }
 0x207   :  { %371 = vmatpush.msrb.mxu2 %v292_v62  ;;  %630 = vmatpush.msra.mxu3 %v292_v62 }
 0x208   :  { %564 = vmatmul.msk.f32.vlgmr.msrb.gmra.mxu2 %vm331_vm0, %v887_v60  ;;  %566 = vmatmul.msk.f32.vlgmr.msra.gmra.mxu3 %vm331_vm0, %v889_v61 }
 0x210   :  { %565 = vmatmul.msk.f32.gmra.mxu2 %vm331_vm0, %v895_v63  ;;  %567 = vmatmul.msk.f32.gmra.mxu3 %vm331_vm0, %v897_v0 }
 0x218   :  { %568 = vmatmul.msk.f32.gmra.mxu3 %vm331_vm0, %v903_v2 }
 0x220   :  { %569 = vmatmul.msk.f32.gmra.mxu3 %vm331_vm0, %v907_v3 }
 0x228   :  { %570 = vmatmul.msk.f32.gmra.mxu3 %vm331_vm0, %v911_v5 }
 0x230   :  { %571 = vmatmul.msk.f32.gmra.mxu3 %vm331_vm0, %v915_v6 }
 0x28b   :  { %v379_v7 = vpop.f32.mrf.mxu3  ;;  %v373_v12 = vpop.f32.mrf.mxu2 }
 0x28c   :  { %v399_v28 = vmul.f32 0.8, %v379_v7  ;;  %v397_v34 = vmul.f32 0.8, %v373_v12 }
 0x28e   :  { %v415_v35 = vadd.f32 %v933_v30, %v399_v28  ;;  %v413_v38 = vadd.f32 %v405_v36, %v397_v34 }
 0x293   :  { %v382_v8 = vpop.f32.mrf.mxu3  ;;  %v376_v26 = vpop.f32.mrf.mxu2 }
 0x294   :  { %v400_v24 = vmul.f32 0.8, %v382_v8  ;;  %v398_v31 = vmul.f32 0.8, %v376_v26 }
 0x296   :  { %v416_v32 = vadd.f32 %v930_v27, %v400_v24  ;;  %v414_v37 = vadd.f32 %v936_v33, %v398_v31 }
 0x29b   :  { %v385_v9 = vpop.f32.mrf.mxu3 }
 0x29c   :  { %v401_v21 = vmul.f32 0.8, %v385_v9 }
 0x29e   :  { %v417_v29 = vadd.f32 %v927_v23, %v401_v21 }
 0x2a3   :  { %v388_v10 = vpop.f32.mrf.mxu3 }
 0x2a4   :  { %v402_v18 = vmul.f32 0.8, %v388_v10 }
 0x2a6   :  { %v418_v25 = vadd.f32 %v924_v20, %v402_v18 }
 0x2ab   :  { %v391_v11 = vpop.f32.mrf.mxu3 }
 0x2ac   :  { %v403_v15 = vmul.f32 0.8, %v391_v11 }
 0x2ae   :  { %v419_v22 = vadd.f32 %v921_v17, %v403_v15 }
 0x2b3   :  { %v394_v13 = vpop.f32.mrf.mxu3 }
 0x2b4   :  { %v404_v16 = vmul.f32 0.8, %v394_v13 }
 0x2b6   :  { %v420_v19 = vadd.f32 %v919_v14, %v404_v16 }
 0x2b8   :  { %429 = vmatpush.msrb.mxu3 %v420_v19 }
 0x2ba   :  { %430 = vmatpush.msrb.mxu3 %v419_v22 }
 0x2bc   :  { %431 = vmatpush.msrb.mxu3 %v418_v25 }
 0x2be   :  { %432 = vmatpush.msrb.mxu3 %v417_v29 }
 0x2c0   :  { %433 = vmatpush.msrb.mxu3 %v416_v32 }
 0x2c2   :  { %434 = vmatpush.msrb.mxu3 %v415_v35 }
 0x2c4   :  { %435 = vmatpush.msrb.mxu3 %v414_v37 }
 0x2c6   :  { %436 = vmatpush.msrb.mxu3 %v413_v38 }
 0x2c7   :  { %572 = vmatmul.msk.f32.vlgmr.msrb.gmra.mxu3 %vm331_vm0, %v887_v60 }
 0x2cf   :  { %573 = vmatmul.msk.f32.gmra.mxu3 %vm331_vm0, %v895_v63 }
 0x2d7   :  { %574 = vmatmul.msk.f32.gmra.mxu3 %vm331_vm0, %v889_v61 }
 0x2df   :  { %575 = vmatmul.msk.f32.gmra.mxu3 %vm331_vm0, %v897_v0 }
 0x2e7   :  { %576 = vmatmul.msk.f32.gmra.mxu3 %vm331_vm0, %v903_v2 }
 0x2ef   :  { %577 = vmatmul.msk.f32.gmra.mxu3 %vm331_vm0, %v907_v3 }
 0x2f7   :  { %578 = vmatmul.msk.f32.gmra.mxu3 %vm331_vm0, %v911_v5 }
 0x2ff   :  { %579 = vmatmul.msk.f32.gmra.mxu3 %vm331_vm0, %v915_v6 }
 0x34a   :  { %v438_v39 = vpop.f32.mrf.mxu3 }
 0x34b   :  { %v462_v59 = vmul.f32 0.8, %v438_v39 }
 0x34d   :  { %v470_v4 = vadd.f32 %v462_v59, %v405_v36 }
 0x352   :  { %v441_v40 = vpop.f32.mrf.mxu3 }
 0x353   :  { %v463_v57 = vmul.f32 0.8, %v441_v40 }
 0x355   :  { %v471_v1 = vadd.f32 %v463_v57, %v936_v33 }
 0x35a   :  { %v444_v41 = vpop.f32.mrf.mxu3 }
 0x35b   :  { %v464_v55 = vmul.f32 0.8, %v444_v41 }
 0x35d   :  { %v472_v62 = vadd.f32 %v464_v55, %v933_v30 }
 0x362   :  { %v447_v42 = vpop.f32.mrf.mxu3 }
 0x363   :  { %v465_v53 = vmul.f32 0.8, %v447_v42 }
 0x365   :  { %v473_v58 = vadd.f32 %v465_v53, %v930_v27 }
 0x36a   :  { %v450_v43 = vpop.f32.mrf.mxu3 }
 0x36b   :  { %v466_v51 = vmul.f32 0.8, %v450_v43 }
 0x36d   :  { %v474_v56 = vadd.f32 %v466_v51, %v927_v23 }
 0x372   :  { %v453_v44 = vpop.f32.mrf.mxu3 }
 0x373   :  { %v467_v49 = vmul.f32 0.8, %v453_v44 }
 0x375   :  { %v475_v54 = vadd.f32 %v467_v49, %v924_v20 }
 0x37a   :  { %v456_v45 = vpop.f32.mrf.mxu3 }
 0x37b   :  { %v468_v47 = vmul.f32 0.8, %v456_v45 }
 0x37d   :  { %v476_v52 = vadd.f32 %v468_v47, %v921_v17 }
 0x382   :  { %v459_v46 = vpop.f32.mrf.mxu3 }
 0x383   :  { %v469_v48 = vmul.f32 0.8, %v459_v46 }
 0x385   :  { %v477_v50 = vadd.f32 %v469_v48, %v919_v14 }
 0x387   :  { %486 = vmatpush.msrb.mxu0 %v477_v50 }
 0x389   :  { %487 = vmatpush.msrb.mxu0 %v476_v52 }
 0x38b   :  { %488 = vmatpush.msrb.mxu0 %v475_v54 }
 0x38d   :  { %489 = vmatpush.msrb.mxu0 %v474_v56 }
 0x38f   :  { %490 = vmatpush.msrb.mxu0 %v473_v58 }
 0x391   :  { %491 = vmatpush.msrb.mxu0 %v472_v62 }
 0x393   :  { %492 = vmatpush.msrb.mxu0 %v471_v1 }
 0x395   :  { %493 = vmatpush.msrb.mxu0 %v470_v4 }
 0x396   :  { %580 = vmatmul.msk.f32.vlgmr.msrb.gmra.mxu0 %vm331_vm0, %v887_v60 }
 0x39e   :  { %581 = vmatmul.msk.f32.gmra.mxu0 %vm331_vm0, %v895_v63 }
 0x3a6   :  { %582 = vmatmul.msk.f32.gmra.mxu0 %vm331_vm0, %v889_v61 }
 0x3ae   :  { %583 = vmatmul.msk.f32.gmra.mxu0 %vm331_vm0, %v897_v0 }
 0x3b6   :  { %584 = vmatmul.msk.f32.gmra.mxu0 %vm331_vm0, %v903_v2 }
 0x3be   :  { %585 = vmatmul.msk.f32.gmra.mxu0 %vm331_vm0, %v907_v3 }
 0x3c6   :  { %586 = vmatmul.msk.f32.gmra.mxu0 %vm331_vm0, %v911_v5 }
 0x3ce   :  { %587 = vmatmul.msk.f32.gmra.mxu0 %vm331_vm0, %v915_v6 }
 0x413   :  { %v495_v60 = vpop.f32.mrf.mxu0 }
 0x414   :  { %v519_v63 = vmul.f32 0.8, %v495_v60 }
 0x416   :  { %v527_v7 = vadd.f32 %v519_v63, %v405_v36 }
 0x418   :  { %535 = vst [vmem:[#allocation11] sm:$0xff] %v527_v7 }
 0x41b   :  { %v498_v61 = vpop.f32.mrf.mxu0 }
 0x41c   :  { %v520_v8 = vmul.f32 0.8, %v498_v61 }
 0x41e   :  { %v528_v0 = vadd.f32 %v520_v8, %v936_v33 }
 0x420   :  { %536 = vst [vmem:[#allocation11 + $0x8] sm:$0xff] %v528_v0 }
 0x423   :  { %v501_v9 = vpop.f32.mrf.mxu0 }
 0x424   :  { %v521_v2 = vmul.f32 0.8, %v501_v9 }
 0x426   :  { %v529_v10 = vadd.f32 %v521_v2, %v933_v30 }
 0x428   :  { %537 = vst [vmem:[#allocation11 + $0x10] sm:$0xff] %v529_v10 }
 0x42b   :  { %v504_v3 = vpop.f32.mrf.mxu0 }
 0x42c   :  { %v522_v11 = vmul.f32 0.8, %v504_v3 }
 0x42e   :  { %v530_v5 = vadd.f32 %v522_v11, %v930_v27 }
 0x430   :  { %538 = vst [vmem:[#allocation11 + $0x18] sm:$0xff] %v530_v5 }
 0x433   :  { %v507_v6 = vpop.f32.mrf.mxu0 }
 0x434   :  { %v523_v12 = vmul.f32 0.8, %v507_v6 }
 0x436   :  { %v531_v13 = vadd.f32 %v523_v12, %v927_v23 }
 0x438   :  { %539 = vst [vmem:[#allocation11 + $0x20] sm:$0xff] %v531_v13 }
 0x43b   :  { %v510_v15 = vpop.f32.mrf.mxu0 }
 0x43c   :  { %v524_v16 = vmul.f32 0.8, %v510_v15 }
 0x43e   :  { %v532_v18 = vadd.f32 %v524_v16, %v924_v20 }
 0x440   :  { %540 = vst [vmem:[#allocation11 + $0x28] sm:$0xff] %v532_v18 }
 0x443   :  { %v513_v19 = vpop.f32.mrf.mxu0 }
 0x444   :  { %v525_v21 = vmul.f32 0.8, %v513_v19 }
 0x446   :  { %v533_v22 = vadd.f32 %v525_v21, %v921_v17 }
 0x448   :  { %541 = vst [vmem:[#allocation11 + $0x30] sm:$0xff] %v533_v22 }
 0x44b   :  { %v516_v24 = vpop.f32.mrf.mxu0 }
 0x44c   :  { %v526_v25 = vmul.f32 0.8, %v516_v24 }
 0x44e   :  { %v534_v23 = vadd.f32 %v526_v25, %v919_v14 }
 0x450   :  { %542 = vst [vmem:[#allocation11 + $0x38] sm:$0xff] %v534_v23 }
 0x451   :  { %555 = dma.vmem_to_hbm [thread:$0]  %s548_s11, 1024, %s550_s16, [#allocation4], %s797_s13, %s797_s13, %s798_s14  }
 0x452   :  { %794 = dma.done.wait [#allocation4], 1024  }
 0x453   :  { %795 = vsyncadd [#allocation4], 4294966272 }
 0x454   :  { %560 = vsyncpa [#allocation3], 1 }
 0x455   :  { %561 = vsyncpa [#allocation6], 1 }
 0x456   :  { %562 = vsyncpa [#allocation9], 1 }
 0x457   :  { %563 = vsyncpa [#allocation4], 1 }

</bundles_post_ra>
